<compile_context>
chip_gen: v7x
topology: tpu7x:2x2x1
jax: 0.10.0
libtpu: 0.0.40
codegen_flags: <defaults>
</compile_context>

<pallas_src>
import functools

import jax
import jax.numpy as jnp
from jax.experimental import pallas as pl
from jax.experimental.pallas import tpu as pltpu


def _round_up(x, m):
    return (x + m - 1) // m * m


def _center_loss_kernel(prob_ref, c_ref, f_ref, out_ref, *, p):
    # prob_ref: (1, TN, K), c_ref: (1, K, D), f_ref: (1, TN, D)
    # out_ref : (1, 1, 8, 128) partial-sum block owned by this grid cell.
    prob = prob_ref[0]                                               # (TN, K)
    c = c_ref[0]                                                     # (K, D)
    pred = jnp.dot(prob, c, preferred_element_type=jnp.float32)      # MXU, (TN, D) f32
    diff = f_ref[0].astype(jnp.float32) - pred                       # (TN, D) f32
    if p == 2.0:
        partial = jnp.sum(diff * diff)
    else:
        partial = jnp.sum(jnp.abs(diff) ** p)
    # Fully-defined, lane-dense block write; the wrapper reads element [0, 0].
    out_ref[0, 0] = jnp.full((8, 128), partial, dtype=jnp.float32)


def center_loss(c, f, prob, n=1, p=2, *, tile_n=256):
    """Pallas TPU CenterLoss.forward. `n` is unused (matches the torch module)."""
    del n
    p = float(p)
    B, N, D = f.shape
    Bc, K, Dc = c.shape
    assert (Bc, Dc) == (B, D) and prob.shape == (B, N, K)

    # Tile the point axis N (sublane-aligned). Padding rows are exact no-ops.
    TN = min(_round_up(N, 8), _round_up(int(tile_n), 8))
    N_pad = _round_up(N, TN)
    if N_pad != N:
        pad = N_pad - N
        f = jnp.pad(f, ((0, 0), (0, pad), (0, 0)))
        prob = jnp.pad(prob, ((0, 0), (0, pad), (0, 0)))
    num_tiles = N_pad // TN

    kernel = functools.partial(_center_loss_kernel, p=p)
    partials = pl.pallas_call(
        kernel,
        out_shape=jax.ShapeDtypeStruct((B, num_tiles, 8, 128), jnp.float32),
        grid=(B, num_tiles),
        in_specs=[
            pl.BlockSpec((1, TN, K), lambda b, i: (b, i, 0)),   # prob tile
            pl.BlockSpec((1, K, D), lambda b, i: (b, 0, 0)),    # centers (per batch)
            pl.BlockSpec((1, TN, D), lambda b, i: (b, i, 0)),   # feature tile
        ],
        out_specs=pl.BlockSpec((1, 1, 8, 128), lambda b, i: (b, i, 0, 0)),
        compiler_params=pltpu.CompilerParams(
            dimension_semantics=("parallel", "parallel"),
            # Explicit, generation-safe scoped-VMEM budget (fits v7x / v6e / v5e).
            vmem_limit_bytes=32 * 1024 * 1024,
        ),
    )(prob, c, f)

    total = jnp.sum(partials[:, :, 0, 0])
    if p == 2.0:
        return jnp.sqrt(total)
    return total ** (1.0 / p)


def _center_loss_ref(c, f, prob, p=2):
    # Pure-JAX reference mirroring torch.norm(f - bmm(prob, c), p).
    p = float(p)
    pred = jnp.einsum("bnk,bkd->bnd",
                      prob.astype(jnp.float32), c.astype(jnp.float32))
    diff = f.astype(jnp.float32) - pred
    if p == 2.0:
        return jnp.sqrt(jnp.sum(diff * diff))
    return jnp.sum(jnp.abs(diff) ** p) ** (1.0 / p)


if __name__ == "__main__":
    key = jax.random.PRNGKey(0)
    kc, kf, kp = jax.random.split(key, 3)
    B, N, K, D = 2, 16, 4, 32        # batch=2, points=16, clusters=4, feat=32
    c = jax.random.normal(kc, (B, K, D), dtype=jnp.float32)
    f = jax.random.normal(kf, (B, N, D), dtype=jnp.float32)
    prob = jax.nn.softmax(jax.random.normal(kp, (B, N, K), dtype=jnp.float32), axis=-1)

    out = jax.block_until_ready(center_loss(c, f, prob))
    ref = jax.block_until_ready(_center_loss_ref(c, f, prob))
    assert jnp.allclose(out, ref, rtol=1e-5, atol=1e-5), (out, ref)
    print("KERNEL_OK")
</pallas_src>

<mosaic_0001>
module attributes {stable_mosaic.version = 11 : i64} {
  func.func @_center_loss_kernel(%arg0: i32, %arg1: i32, %arg2: memref<1x16x4xf32, #tpu.memory_space<vmem>>, %arg3: memref<1x4x32xf32, #tpu.memory_space<vmem>>, %arg4: memref<1x16x32xf32, #tpu.memory_space<vmem>>, %arg5: memref<1x1x8x128xf32, #tpu.memory_space<vmem>>) attributes {dimension_semantics = [#tpu.dimension_semantics<parallel>, #tpu.dimension_semantics<parallel>], iteration_bounds = array<i64: 2, 1>, scalar_prefetch = 0 : i64, scratch_operands = 0 : i64, tpu.core_type = #tpu.core_type<tc>, window_params = [{transform_indices = @transform_0, window_bounds = array<i64: 1, 16, 4>}, {transform_indices = @transform_1, window_bounds = array<i64: 1, 4, 32>}, {transform_indices = @transform_2, window_bounds = array<i64: 1, 16, 32>}, {transform_indices = @transform_3, window_bounds = array<i64: 1, 1, 8, 128>}]} {
    %c0 = arith.constant 0 : index
    %c0_0 = arith.constant 0 : index
    %c0_1 = arith.constant 0 : index
    %0 = vector.load %arg2[%c0, %c0_0, %c0_1] : memref<1x16x4xf32, #tpu.memory_space<vmem>>, vector<1x16x4xf32>
    %1 = vector.shape_cast %0 : vector<1x16x4xf32> to vector<16x4xf32>
    %c0_2 = arith.constant 0 : index
    %c0_3 = arith.constant 0 : index
    %c0_4 = arith.constant 0 : index
    %2 = vector.load %arg3[%c0_2, %c0_3, %c0_4] : memref<1x4x32xf32, #tpu.memory_space<vmem>>, vector<1x4x32xf32>
    %3 = vector.shape_cast %2 : vector<1x4x32xf32> to vector<4x32xf32>
    %cst = arith.constant dense<0.000000e+00> : vector<16x32xf32>
    %4 = tpu.matmul %1, %3, %cst {dimension_numbers = #tpu.dot_dimension_numbers<[1], [0], [0], [1], [0, 0, 1, 1], [], []>} : vector<16x4xf32>, vector<4x32xf32>, vector<16x32xf32> -> vector<16x32xf32>
    %c0_5 = arith.constant 0 : index
    %c0_6 = arith.constant 0 : index
    %c0_7 = arith.constant 0 : index
    %5 = vector.load %arg4[%c0_5, %c0_6, %c0_7] : memref<1x16x32xf32, #tpu.memory_space<vmem>>, vector<1x16x32xf32>
    %6 = vector.shape_cast %5 : vector<1x16x32xf32> to vector<16x32xf32>
    %7 = arith.subf %6, %4 : vector<16x32xf32>
    %8 = arith.mulf %7, %7 : vector<16x32xf32>
    %9 = vector.shape_cast %8 : vector<16x32xf32> to vector<1x16x32xf32>
    %cst_8 = arith.constant dense<0.000000e+00> : vector<1xf32>
    %10 = vector.multi_reduction <add>, %9, %cst_8 [1, 2] : vector<1x16x32xf32> to vector<1xf32>
    %11 = vector.shape_cast %10 : vector<1xf32> to vector<1x1x1xf32>
    %12 = vector.extract %11[0, 0, 0] : f32 from vector<1x1x1xf32>
    %13 = vector.broadcast %12 : f32 to vector<8x128xf32>
    %c0_9 = arith.constant 0 : index
    %c0_10 = arith.constant 0 : index
    %c0_11 = arith.constant 0 : index
    %c0_12 = arith.constant 0 : index
    %14 = vector.load %arg5[%c0_9, %c0_10, %c0_11, %c0_12] : memref<1x1x8x128xf32, #tpu.memory_space<vmem>>, vector<1x1x8x128xf32>
    %15 = vector.shape_cast %14 : vector<1x1x8x128xf32> to vector<8x128xf32>
    %16 = vector.shape_cast %13 : vector<8x128xf32> to vector<1x1x8x128xf32>
    tpu.vector_store %arg5[%c0_9, %c0_10, %c0_11, %c0_12], %16 {strides = array<i32>} : memref<1x1x8x128xf32, #tpu.memory_space<vmem>>, vector<1x1x8x128xf32>,
    return
  }
  func.func @transform_0(%arg0: i32, %arg1: i32) -> (i32, i32, i32) {
    %c0_i32 = arith.constant 0 : i32
    %c0_i32_0 = arith.constant 0 : i32
    return %arg0, %arg1, %c0_i32 : i32, i32, i32
  }
  func.func @transform_1(%arg0: i32, %arg1: i32) -> (i32, i32, i32) {
    %c0_i32 = arith.constant 0 : i32
    %c0_i32_0 = arith.constant 0 : i32
    %c0_i32_1 = arith.constant 0 : i32
    return %arg0, %c0_i32, %c0_i32_0 : i32, i32, i32
  }
  func.func @transform_2(%arg0: i32, %arg1: i32) -> (i32, i32, i32) {
    %c0_i32 = arith.constant 0 : i32
    %c0_i32_0 = arith.constant 0 : i32
    return %arg0, %arg1, %c0_i32 : i32, i32, i32
  }
  func.func @transform_3(%arg0: i32, %arg1: i32) -> (i32, i32, i32, i32) {
    %c0_i32 = arith.constant 0 : i32
    %c0_i32_0 = arith.constant 0 : i32
    %c0_i32_1 = arith.constant 0 : i32
    return %arg0, %arg1, %c0_i32, %c0_i32_0 : i32, i32, i32, i32
  }
}

</mosaic_0001>

<bundles_post_ra>
// kernel: tpu_custom_call.1
= control target key start
LH: loop header
LB: loop body
LE: loop exit
PB: predicated region body
PF: predicated region fallthrough
CT: control target
= control target key end

     0   :  { %8 = vsyncpa [#allocation3], 0  ;;  %s785_s0 = inlined_call_operand.vmem [shape: f32[2,16,4], index: 0, kind: input, shape index: {}]   ;;  %s786_s1 = inlined_call_operand.vmem [shape: f32[2,4,32], index: 1, kind: input, shape index: {}]   ;;  %s787_s2 = inlined_call_operand.vmem [shape: f32[2,16,32], index: 2, kind: input, shape index: {}]   ;;  %s788_s3 = inlined_call_operand.hbm [shape: f32[2,1,8,128], index: 3, kind: output, shape index: {}]  }
   0x1   :  { %10 = vsyncpa [#allocation3 + $0x1], 0  ;;  %s667_s12 = smov 0   ;;  %s669_s13 = smov 0  }
   0x2   :  { %s671_s14 = smov 0   ;;  %s673_s15 = smov 0  }
   0x3   :  { %s675_s16 = smov 0   ;;  %s677_s17 = smov 0  }
   0x4 LB: > { %s481_s18 = sadd.s32 4294967295, %s644_s17   ;;  %s482_s19 = sadd.s32 4294967294, %s644_s17   ;;  %s644_s17 = sphi %s677_s17, %s16_s17   ;;  %s640_s16 = sphi %s675_s16, %s795_s16   ;;  %s636_s15 = sphi %s673_s15, %s794_s15   ;;  %s632_s14 = sphi %s671_s14, %s793_s14   ;;  %s628_s13 = sphi %s669_s13, %s792_s13   ;;  %s624_s12 = sphi %s667_s12, %s791_s12  }
   0x5   : > { %s28_s20 = sadd.s32 1, %s640_s16  ;;  %s119_s21 = sadd.s32 1, %s632_s14 }
   0x6   : > { %p30_p0 = scmp.ge.s32.totalorder %s28_s20, 2  ;;  %p129_p1 = scmp.ne.s32.totalorder %s632_s14, %s628_s13 }
   0x7   : > { %p130_p2 = scmp.eq.s32.totalorder %s481_s18, 1  ;;  %p135_p3 = scmp.ne.s32.totalorder %s628_s13, %s624_s12 }
   0x8   : > { %s797_s20 = smov (%p30_p0, %s28_s20), 0  ;;  %p136_p5 = scmp.eq.s32.totalorder %s482_s19, 1 }
   0x9   : > { %p707_p4 = por %p130_p2, %p129_p1  ;;  %s114_s23 = ssub.s32 %s640_s16, %s797_s20 }
   0xa   : > { %p485_p6 = scmp.ge.s32.totalorder %s644_s17, 1  ;;  %p117_p7 = scmp.eq.s32.totalorder %s114_s23, 0 }
   0xb   : > { %p714_p8 = por %p136_p5, %p135_p3  ;;  %p187_p9 = scmp.lt.s32.totalorder %s644_s17, 3 }
   0xc   : > { %s720_s25 = scalar_select %p117_p7, %s632_s14, %s119_s21  }
   0xd   : > { %p188_p10 = pnand %p485_p6, %p187_p9 }
   0xe   : > { %p229_p11 = scmp.lt.s32.totalorder (!%p188_p10), %s636_s15, 1  ;;  %vm262_vm0 = vcmask (!%p188_p10), 1043456   ;;  %vm255_vm1 = vcmask (!%p188_p10), 31744   ;;  %vm347_vm2 = vcmask (!%p188_p10), 261120   ;;  %s225_s11 = sand.u32 (!%p188_p10), 1, %s628_s13  }
   0xf   : > { %191 = sbr.rel (%p188_p10) target bundleno = 468 (0x1d4), region = 32  ;;  %s486_s18 = sshll.u32 (!%p188_p10), %s225_s11, 3 }
  0x10   : > { %s227_s19 = scalar_lea.vmem (!%p188_p10), [#allocation2], %s486_s18  ;;  %s496_s23 = sshll.u32 (!%p188_p10), %s636_s15, 7 }
  0x11   : > { %s377_s21 = sshll.u32 (!%p188_p10), %s227_s19, 4  ;;  %s740_s29 = scalar_lea.hbm (!%p188_p10), %s788_s3, %s496_s23  ;;  %s735_s21 = int_to_ptr.vmem [resolvable:$true] %s377_s21 }
  0x12   : > { %s363_s30 = scalar_lea.sflag (!%p188_p10), [#allocation3], %s225_s11 }
  0x16   : > { %s230_s26 = scalar_select %p229_p11, %s636_s15, 1 }
  0x17   : > { %s646_s15 = smov [#allocation2]  }
  0x18   : > { %s489_s27 = sshll.u32 %s230_s26, 2  ;;  %s499_s28 = sshll.u32 %s230_s26, 4 }
  0x19   : > { %s241_s4 = scalar_lea.vmem %s786_s1, %s489_s27  ;;  %s236_s7 = scalar_lea.vmem %s785_s0, %s499_s28 }
  0x1a   : > { %v254_v0 = vld [vmem:[%s241_s4] sm:$0xf]  ;;  %v253_v2 = vld [vmem:[%s236_s7 + $0x8] sm:$0xff]  ;;  %s250_s10 = scalar_lea.vmem %s787_s2, %s499_s28  ;;  %s566_s4 = scalar_lea.vmem %s735_s21, 128 }
  0x1b   : > { %v252_v1 = vld [vmem:[%s236_s7] sm:$0xff]  ;;  %504 = vmatprep.subr.msk.mxu0 %vm262_vm0, %v254_v0  ;;  %v342_v3 = vld [vmem:[%s250_s10 + $0x8] sm:$0xff]  ;;  %p567_p12 = scmp.ne.s32.totalorder %s735_s21, %s566_s4  ;;  %s570_s5 = sshll.u32 %s646_s15, 4  ;;  %s571_s5 = int_to_ptr.vmem [resolvable:$false] %s570_s5 }
  0x1c   : > { %506 = vmatprep.mubr.msk.f32.mxu0 %vm255_vm1, %v252_v1  ;;  %505 = vmatpush3.msk.msra.mxu0 %vm262_vm0, %v254_v0  ;;  %v341_v4 = vld [vmem:[%s250_s10] sm:$0xff]  ;;  %s572_s6 = scalar_lea.vmem %s571_s5, 256  ;;  %p573_p1 = scmp.lt.s32.totalorder %s735_s21, %s571_s5 }
  0x1d   : > { %507 = vmatmul.mubr.msk.f32.vlgmr.msra.gmra.mrb[0].mxu0 %vm255_vm1, %v253_v2  ;;  %p568_p13 = pnand %p567_p12, %p707_p4  ;;  %p574_p2 = scmp.lt.s32.totalorder %s572_s6, %s566_s4 }
  0x1f   : > { %p569_p0 = pneg %p568_p13  ;;  %p575_p3 = por %p574_p2, %p573_p1 }
  0x21   : > { %p576_p5 = pnand %p575_p3, %p569_p0 }
  0xf0   : > { %v508_v5 = vpop.f32.mrb[0].mxu0 }
  0xf1   : > { %v344_v6 = vsub.f32 %v342_v3, %v508_v5  ;;  %v332_v7 = vpop.f32.mrb[1].mxu0 }
  0xf2   : > { %v343_v8 = vsub.f32 %v341_v4, %v332_v7 }
  0xf3   : > { %v346_v9 = vmul.f32 %v344_v6, %v344_v6 }
  0xf4   : > { %v345_v10 = vmul.f32 %v343_v8, %v343_v8 }
  0xf5   : > { %v349_v11 = vsel %vm347_vm2, %v346_v9, 0.0 }
  0xf6   : > { %v348_v12 = vsel %vm347_vm2, %v345_v10, 0.0 }
  0xf7   : > { %v350_v13 = vadd.f32 %v349_v11, %v348_v12 }
  0xf9   : > { %351 = vadd.xlane.f32.xlu0 %v350_v13 }
 0x186   : > { %v352_v14 = vpop.xlane.xlu0 %351 }
 0x187   : > { %v353_v15 = vrot.slane %v352_v14, 4 }
 0x189   : > { %v354_v16 = vadd.f32 %v353_v15, %v352_v14 }
 0x18b   : > { %v355_v17 = vrot.slane %v354_v16, 2 }
 0x18d   : > { %v356_v18 = vadd.f32 %v355_v17, %v354_v16 }
 0x18f   : > { %v357_v19 = vrot.slane %v356_v18, 1 }
 0x191   : > { %v358_v20 = vadd.f32 %v357_v19, %v356_v18 }
 0x193   : > { %509 = vpush %v358_v20 }
 0x1c4   : > { %s510_s26 = spop %509 }
 0x1c5   : > { %v360_v21 = vstv %s510_s26 }
 0x1c6   : > { %361 = vst [vmem:[%s227_s19] sm:$0xff] %v360_v21 }
 0x1c7   : > { %579 = shalt.err (!%p576_p5)
}
 0x1c8   : > { %s580_s7 = scalar_lea.hbm %s740_s29, 128  ;;  %s584_s10 = scalar_lea.hbm %s788_s3, 256 }
 0x1c9   : > { %p581_p6 = scmp.ne.s32.totalorder %s740_s29, %s580_s7  ;;  %p585_p10 = scmp.lt.u32.totalorder %s740_s29, %s788_s3 }
 0x1ca   : > { %p586_p11 = scmp.lt.u32.totalorder %s584_s10, %s580_s7  ;;  %p588_p13 = scmp.lt.u32.totalorder %s580_s7, %s740_s29 }
 0x1cb   : > { %p582_p7 = pnand %p581_p6, %p707_p4 }
 0x1cc   : > { %p587_p12 = por %p586_p11, %p585_p10 }
 0x1cd   : > { %p583_p9 = pneg %p582_p7 }
 0x1ce   : > { %p589_p0 = por %p588_p13, %p587_p12 }
 0x1d0   : > { %p590_p1 = pnand %p589_p0, %p583_p9 }
 0x1d2   : > { %593 = shalt.err (!%p590_p1)
}
 0x1d3   : > { %511 = dma.vmem_to_hbm [thread:$0]  (%p707_p4), %s735_s21, 128, %s740_s29, %s363_s30  }
 0x1d4 PF: > { %p517_p2 = scmp.ge.s32.totalorder %s644_s17, 2  ;;  %s389_s19 = sand.u32 1, %s624_s12  }
 0x1d5   : > { %s390_s23 = scalar_lea.sflag [#allocation3], %s389_s19 }
 0x1d6   : > { %p514_p3 = pnand %p517_p2, %p714_p8 }
 0x1d8   : > { %619 = dma.done.wait (!%p514_p3), %s390_s23, 128  }
 0x1d9   : > { %621 = vsyncadd (!%p514_p3), %s390_s23, 4294967168  ;;  %s16_s17 = sadd.s32 1, %s644_s17   ;;  %s791_s12 = smov %s628_s13 }
 0x1da   : > { %p13_p5 = scmp.ge.s32.totalorder %s16_s17, 4   ;;  %s792_s13 = smov %s632_s14 }
 0x1db   : > { %s793_s14 = smov %s720_s25  ;;  %s794_s15 = smov %s640_s16 }
 0x1dc   : > { %s795_s16 = smov %s797_s20  ;;  %15 = sbr.rel (!%p13_p5) target bundleno = 4 (0x4), region = 73 }
 0x1e3   :  { %395 = vsyncpa [#allocation3], 1 }
 0x1e4   :  { %397 = vsyncpa [#allocation3 + $0x1], 1 }

</bundles_post_ra>
